<compile_context>
chip_gen: v7x
topology: tpu7x:2x2x1
jax: 0.10.0
libtpu: 0.0.40
codegen_flags: <defaults>
</compile_context>

<pallas_src>
import functools
import math

import jax
import jax.numpy as jnp
import numpy as np
from jax import lax
from jax.experimental import pallas as pl
from jax.experimental.pallas import tpu as pltpu


def _amdim_nce_kernel(mask_ref, src_ref, trg_ref, sel_ref, part_ref,
                      m_sc, l_sc, pos_sc, sq_sc, *, tclip, emb_dim):
    # mask_ref: (TB, TC)   bf16  expanded positive mask chunk ({0,1})
    # src_ref : (TB, E)    bf16  anchor rows for this row tile
    # trg_ref : (E, TC)    bf16  positive-feature columns for this chunk
    # sel_ref : (TC, nfv)  f32   group-sum selection matrix (chunk-invariant)
    # part_ref: (1, 8, 128) f32  per-row-tile partials: [0,0,0]=sum(nce), [0,0,1]=sum(raw^2)
    # scratch : running neg-max (TB,1), running neg sum-exp (TB,1),
    #           pos-score accumulator (TB,nfv), sum of squared pre-clip scores (TB,1)
    c = pl.program_id(1)

    @pl.when(c == 0)
    def _():
        m_sc[...] = jnp.full_like(m_sc, -tclip)   # torch pins positives at -tclip
        l_sc[...] = jnp.zeros_like(l_sc)
        pos_sc[...] = jnp.zeros_like(pos_sc)
        sq_sc[...] = jnp.zeros_like(sq_sc)

    # raw scores for this chunk: (TB, E) @ (E, TC), bf16 in / f32 accumulate (MXU)
    raw = jnp.dot(src_ref[...], trg_ref[...], preferred_element_type=jnp.float32)
    raw = raw * (1.0 / (emb_dim ** 0.5))          # (TB, TC) f32

    # lgt_reg partial uses the pre-clip scores
    sq_sc[...] += jnp.sum(raw * raw, axis=1, keepdims=True)

    # tanh soft clip to [-tclip, tclip]
    raw = tclip * jnp.tanh(raw * (1.0 / tclip))

    is_pos = mask_ref[...] > 0.5

    # positive scores, grouped over the nfv feature positions:
    # (TB, TC) @ (TC, nfv) at HIGHEST precision keeps pos_scores at f32 accuracy.
    masked = jnp.where(is_pos, raw, 0.0)
    pos_sc[...] += jnp.dot(masked, sel_ref[...],
                           preferred_element_type=jnp.float32,
                           precision=lax.Precision.HIGHEST)

    # negatives with positives pinned to -tclip, streamed log-sum-exp across column chunks.
    # TODO(synk): the fused where-masking assumes a {0,1} mask_mat (same assumption the
    # torch "pin to -tclip" trick relies on); soft masks need the original mask_neg algebra.
    neg_eff = jnp.where(is_pos, -tclip, raw)                      # (TB, TC)
    m_prev = m_sc[...]
    m_new = jnp.maximum(m_prev, jnp.max(neg_eff, axis=1, keepdims=True))
    l_sc[...] = jnp.exp(m_prev - m_new) * l_sc[...] + jnp.sum(
        jnp.where(is_pos, 0.0, jnp.exp(neg_eff - m_new)), axis=1, keepdims=True)
    m_sc[...] = m_new

    @pl.when(c == pl.num_programs(1) - 1)
    def _():
        pos_shiftexp = pos_sc[...] - m_sc[...]                    # (TB, nfv)
        nce = pos_shiftexp - jnp.log(jnp.exp(pos_shiftexp) + l_sc[...])
        nce_sum = jnp.sum(nce)
        sq_sum = jnp.sum(sq_sc[...])
        # lane-dense per-row-tile partial write (only executed on the last column step)
        sub = lax.broadcasted_iota(jnp.int32, (1, 8, 128), 1)
        lane = lax.broadcasted_iota(jnp.int32, (1, 8, 128), 2)
        part_ref[...] = jnp.where((sub == 0) & (lane == 0), nce_sum,
                                  jnp.where((sub == 0) & (lane == 1), sq_sum, 0.0))


def _vmem_capacity_bytes():
    """Physical per-core VMEM; conservative (v7x-class) fallback if unknown."""
    try:
        info = pltpu.get_tpu_info()
        cap = getattr(info, "vmem_capacity_bytes", None)
        if cap:
            return int(cap)
    except Exception:
        pass
    return 64 * 1024 * 1024


def _pick_tile_rows(B, cap):
    """Largest multiple-of-8 row tile <= cap dividing B that still yields >=2 row tiles
    (so 'parallel' sharding / DMA overlap kicks in); else process the whole batch."""
    upper = min(cap, B // 2)
    upper -= upper % 8
    for tb in range(upper, 7, -8):
        if B % tb == 0:
            return tb
    # TODO(synk): for large B with no multiple-of-8 divisor this disables row tiling
    # and can exceed the VMEM budget instead of failing loudly.
    return B


def _pick_col_tile(BN, nfv, max_cols):
    """Column tile: multiple of lcm(nfv, 128) dividing BN (keeps sel chunk-invariant and
    lane-aligned), as large as possible within max_cols; else the whole BN axis."""
    base = (nfv * 128) // math.gcd(nfv, 128)
    if base > BN or BN % base != 0:
        return BN
    cands = [t for t in range(base, BN + 1, base) if BN % t == 0]
    fitting = [t for t in cands if t <= max_cols]
    return max(fitting) if fitting else min(cands)


def amdim_nce_loss(r_src, r_trg, mask_mat, tclip):
    B, E = r_src.shape
    BN = r_trg.shape[1]
    nfv = BN // B

    # generation-aware budgets (v7x-class: 64 MiB VMEM -> smaller tiles & limit)
    vmem_cap = _vmem_capacity_bytes()
    vmem_limit = min(int(vmem_cap * 0.8), 110 * 1024 * 1024)
    row_cap = 128 if vmem_cap <= 64 * 1024 * 1024 else 256

    TB = _pick_tile_rows(B, row_cap)
    num_row = B // TB

    # rough per-column VMEM cost: r_trg bf16 dbl-buf + mask bf16 dbl-buf + ~5 f32 temps
    bytes_per_col = 4 * E + 4 * TB + 20 * TB
    max_cols = max(128, (vmem_limit // 2) // bytes_per_col)
    TC = _pick_col_tile(BN, nfv, max_cols)
    num_col = BN // TC

    # bf16 MXU operands (f32 accumulation inside the kernel)
    r_src_b = r_src.astype(jnp.bfloat16)
    r_trg_b = r_trg.astype(jnp.bfloat16)
    # expanded positive mask, built once with plain XLA ({0,1} exact in bf16)
    mask_pos = jnp.repeat(mask_mat.astype(jnp.bfloat16), nfv, axis=1)      # (B, BN)
    # nfv-group selection matrix; identical for every column chunk since TC % nfv == 0
    sel = (jnp.arange(TC)[:, None] % nfv == jnp.arange(nfv)[None, :]).astype(jnp.float32)

    kernel = functools.partial(_amdim_nce_kernel, tclip=float(tclip), emb_dim=E)

    parts = pl.pallas_call(
        kernel,
        out_shape=jax.ShapeDtypeStruct((num_row, 8, 128), jnp.float32),
        grid=(num_row, num_col),
        in_specs=[
            pl.BlockSpec((TB, TC), lambda i, c: (i, c)),    # expanded mask chunk
            pl.BlockSpec((TB, E), lambda i, c: (i, 0)),     # anchor rows (constant in c)
            pl.BlockSpec((E, TC), lambda i, c: (0, c)),     # r_trg column chunk
            pl.BlockSpec((TC, nfv), lambda i, c: (0, 0)),   # selection matrix (resident)
        ],
        out_specs=pl.BlockSpec((1, 8, 128), lambda i, c: (i, 0, 0)),
        scratch_shapes=[
            pltpu.VMEM((TB, 1), jnp.float32),     # running neg max
            pltpu.VMEM((TB, 1), jnp.float32),     # running neg sum-exp
            pltpu.VMEM((TB, nfv), jnp.float32),   # pos-score accumulator
            pltpu.VMEM((TB, 1), jnp.float32),     # sum of raw^2 per row
        ],
        compiler_params=pltpu.CompilerParams(
            dimension_semantics=("parallel", "arbitrary"),
            vmem_limit_bytes=int(vmem_limit),
        ),
    )(mask_pos, r_src_b, r_trg_b, sel)

    nce_sum = jnp.sum(parts[:, 0, 0])
    sq_sum = jnp.sum(parts[:, 0, 1])
    nce_scores = -nce_sum / (B * nfv)
    lgt_reg = 0.05 * sq_sum / (B * BN)
    return nce_scores, lgt_reg


def _reference(r_src, r_trg, mask_mat, tclip, matmul_dtype=jnp.float32):
    """Pure-JAX transcription of the torch forward. matmul_dtype lets us mimic the
    bf16-rounded MXU operands for a tight structural check."""
    B, E = r_src.shape
    nfv = r_trg.shape[1] // B
    a = r_src.astype(matmul_dtype).astype(jnp.float32)
    b = r_trg.astype(matmul_dtype).astype(jnp.float32)
    mask_pos = jnp.broadcast_to(mask_mat.astype(jnp.float32)[:, :, None], (B, B, nfv))
    mask_neg = 1.0 - mask_pos
    raw = (a @ b).reshape(B, B, nfv) / (E ** 0.5)
    lgt_reg = 0.05 * jnp.mean(raw ** 2)
    raw = tclip * jnp.tanh(raw / tclip)
    pos_scores = jnp.sum(mask_pos * raw, axis=1)
    neg_scores = (mask_neg * raw - tclip * mask_pos).reshape(B, -1)
    mask_neg_f = mask_neg.reshape(B, -1)
    neg_maxes = jnp.max(neg_scores, axis=1, keepdims=True)
    neg_sumexp = jnp.sum(mask_neg_f * jnp.exp(neg_scores - neg_maxes), axis=1, keepdims=True)
    pos_shiftexp = pos_scores - neg_maxes
    all_lse = jnp.log(jnp.exp(pos_shiftexp) + neg_sumexp)
    nce = -jnp.mean(pos_shiftexp - all_lse)
    return nce, lgt_reg


if __name__ == "__main__":
    # small, module-consistent shapes: batch=8, emb_dim=32, nfv=16 (e.g. 4x4 feature map)
    B, E, NFV = 8, 32, 16
    TCLIP = 10.0

    key = jax.random.PRNGKey(0)
    k1, k2 = jax.random.split(key)
    r_src = jax.random.normal(k1, (B, E), dtype=jnp.float32)
    r_trg = jax.random.normal(k2, (E, B * NFV), dtype=jnp.float32)
    mask_mat = jnp.eye(B, dtype=jnp.float32)   # standard AMDIM positive mask

    nce, reg = amdim_nce_loss(r_src, r_trg, mask_mat, TCLIP)
    jax.block_until_ready((nce, reg))

    # tight check against a reference that mimics the bf16 MXU operands
    nce_m, reg_m = _reference(r_src, r_trg, mask_mat, TCLIP, matmul_dtype=jnp.bfloat16)
    assert np.allclose(float(nce), float(nce_m), rtol=2e-3, atol=2e-3), (float(nce), float(nce_m))
    assert np.allclose(float(reg), float(reg_m), rtol=2e-3, atol=1e-4), (float(reg), float(reg_m))

    # loose check against the full-f32 torch-faithful reference (bf16 operand drift)
    nce_f, reg_f = _reference(r_src, r_trg, mask_mat, TCLIP, matmul_dtype=jnp.float32)
    assert np.allclose(float(nce), float(nce_f), rtol=3e-2, atol=3e-2), (float(nce), float(nce_f))
    assert np.allclose(float(reg), float(reg_f), rtol=3e-2, atol=1e-3), (float(reg), float(reg_f))

    print("KERNEL_OK")
</pallas_src>

<mosaic_0001>
module attributes {stable_mosaic.version = 11 : i64} {
  func.func @_amdim_nce_kernel(%arg0: i32, %arg1: i32, %arg2: memref<8x128xbf16, #tpu.memory_space<vmem>>, %arg3: memref<8x32xbf16, #tpu.memory_space<vmem>>, %arg4: memref<32x128xbf16, #tpu.memory_space<vmem>>, %arg5: memref<128x16xf32, #tpu.memory_space<vmem>>, %arg6: memref<1x8x128xf32, #tpu.memory_space<vmem>>, %arg7: memref<8x1xf32, #tpu.memory_space<vmem>>, %arg8: memref<8x1xf32, #tpu.memory_space<vmem>>, %arg9: memref<8x16xf32, #tpu.memory_space<vmem>>, %arg10: memref<8x1xf32, #tpu.memory_space<vmem>>) attributes {dimension_semantics = [#tpu.dimension_semantics<parallel>, #tpu.dimension_semantics<arbitrary>], iteration_bounds = array<i64: 1, 1>, scalar_prefetch = 0 : i64, scratch_operands = 4 : i64, tpu.core_type = #tpu.core_type<tc>, window_params = [{transform_indices = @transform_0, window_bounds = array<i64: 8, 128>}, {transform_indices = @transform_1, window_bounds = array<i64: 8, 32>}, {transform_indices = @transform_2, window_bounds = array<i64: 32, 128>}, {pipeline_mode = #tpu.pipeline_mode<synchronous>, transform_indices = @transform_3, window_bounds = array<i64: 128, 16>}, {transform_indices = @transform_4, window_bounds = array<i64: 1, 8, 128>}]} {
    %c0_i32 = arith.constant 0 : i32
    %0 = arith.cmpi eq, %arg1, %c0_i32 : i32
    %1 = arith.extui %0 : i1 to i32
    %c0_i32_0 = arith.constant 0 : i32
    %2 = arith.cmpi ne, %1, %c0_i32_0 : i32
    scf.if %2 {
      %cst_37 = arith.constant -1.000000e+01 : f32
      %52 = vector.broadcast %cst_37 : f32 to vector<8x1xf32>
      %c0_38 = arith.constant 0 : index
      %c0_39 = arith.constant 0 : index
      %53 = vector.load %arg7[%c0_38, %c0_39] : memref<8x1xf32, #tpu.memory_space<vmem>>, vector<8x1xf32>
      tpu.vector_store %arg7[%c0_38, %c0_39], %52 {strides = array<i32>} : memref<8x1xf32, #tpu.memory_space<vmem>>, vector<8x1xf32>,
      %cst_40 = arith.constant 0.000000e+00 : f32
      %54 = vector.broadcast %cst_40 : f32 to vector<8x1xf32>
      %c0_41 = arith.constant 0 : index
      %c0_42 = arith.constant 0 : index
      %55 = vector.load %arg8[%c0_41, %c0_42] : memref<8x1xf32, #tpu.memory_space<vmem>>, vector<8x1xf32>
      tpu.vector_store %arg8[%c0_41, %c0_42], %54 {strides = array<i32>} : memref<8x1xf32, #tpu.memory_space<vmem>>, vector<8x1xf32>,
      %cst_43 = arith.constant 0.000000e+00 : f32
      %56 = vector.broadcast %cst_43 : f32 to vector<8x16xf32>
      %c0_44 = arith.constant 0 : index
      %c0_45 = arith.constant 0 : index
      %57 = vector.load %arg9[%c0_44, %c0_45] : memref<8x16xf32, #tpu.memory_space<vmem>>, vector<8x16xf32>
      tpu.vector_store %arg9[%c0_44, %c0_45], %56 {strides = array<i32>} : memref<8x16xf32, #tpu.memory_space<vmem>>, vector<8x16xf32>,
      %cst_46 = arith.constant 0.000000e+00 : f32
      %58 = vector.broadcast %cst_46 : f32 to vector<8x1xf32>
      %c0_47 = arith.constant 0 : index
      %c0_48 = arith.constant 0 : index
      %59 = vector.load %arg10[%c0_47, %c0_48] : memref<8x1xf32, #tpu.memory_space<vmem>>, vector<8x1xf32>
      tpu.vector_store %arg10[%c0_47, %c0_48], %58 {strides = array<i32>} : memref<8x1xf32, #tpu.memory_space<vmem>>, vector<8x1xf32>,
    } else {
    }
    %c0 = arith.constant 0 : index
    %c0_1 = arith.constant 0 : index
    %3 = vector.load %arg3[%c0, %c0_1] : memref<8x32xbf16, #tpu.memory_space<vmem>>, vector<8x32xbf16>
    %c0_2 = arith.constant 0 : index
    %c0_3 = arith.constant 0 : index
    %4 = vector.load %arg4[%c0_2, %c0_3] : memref<32x128xbf16, #tpu.memory_space<vmem>>, vector<32x128xbf16>
    %cst = arith.constant dense<0.000000e+00> : vector<8x128xf32>
    %5 = tpu.matmul %3, %4, %cst {dimension_numbers = #tpu.dot_dimension_numbers<[1], [0], [0], [1], [0, 0, 1, 1], [], []>} : vector<8x32xbf16>, vector<32x128xbf16>, vector<8x128xf32> -> vector<8x128xf32>
    %cst_4 = arith.constant 0.176776692 : f32
    %6 = vector.broadcast %cst_4 : f32 to vector<8x128xf32>
    %7 = arith.mulf %5, %6 : vector<8x128xf32>
    %c0_5 = arith.constant 0 : index
    %c0_6 = arith.constant 0 : index
    %8 = vector.load %arg10[%c0_5, %c0_6] : memref<8x1xf32, #tpu.memory_space<vmem>>, vector<8x1xf32>
    %9 = arith.mulf %7, %7 : vector<8x128xf32>
    %cst_7 = arith.constant dense<0.000000e+00> : vector<8xf32>
    %10 = vector.multi_reduction <add>, %9, %cst_7 [1] : vector<8x128xf32> to vector<8xf32>
    %11 = vector.shape_cast %10 : vector<8xf32> to vector<8x1xf32>
    %12 = arith.addf %8, %11 : vector<8x1xf32>
    %c0_8 = arith.constant 0 : index
    %c0_9 = arith.constant 0 : index
    %13 = vector.load %arg10[%c0_8, %c0_9] : memref<8x1xf32, #tpu.memory_space<vmem>>, vector<8x1xf32>
    tpu.vector_store %arg10[%c0_8, %c0_9], %12 {strides = array<i32>} : memref<8x1xf32, #tpu.memory_space<vmem>>, vector<8x1xf32>,
    %cst_10 = arith.constant 1.000000e-01 : f32
    %14 = vector.broadcast %cst_10 : f32 to vector<8x128xf32>
    %15 = arith.mulf %7, %14 : vector<8x128xf32>
    %16 = math.tanh %15 : vector<8x128xf32>
    %cst_11 = arith.constant 1.000000e+01 : f32
    %17 = vector.broadcast %cst_11 : f32 to vector<8x128xf32>
    %18 = arith.mulf %17, %16 : vector<8x128xf32>
    %c0_12 = arith.constant 0 : index
    %c0_13 = arith.constant 0 : index
    %19 = vector.load %arg2[%c0_12, %c0_13] : memref<8x128xbf16, #tpu.memory_space<vmem>>, vector<8x128xbf16>
    %cst_14 = arith.constant 5.000000e-01 : bf16
    %20 = vector.broadcast %cst_14 : bf16 to vector<8x128xbf16>
    %21 = arith.cmpf ogt, %19, %20 : vector<8x128xbf16>
    %cst_15 = arith.constant 0.000000e+00 : f32
    %22 = vector.broadcast %cst_15 : f32 to vector<8x128xf32>
    %23 = arith.select %21, %18, %22 : vector<8x128xi1>, vector<8x128xf32>
    %c0_16 = arith.constant 0 : index
    %c0_17 = arith.constant 0 : index
    %24 = vector.load %arg9[%c0_16, %c0_17] : memref<8x16xf32, #tpu.memory_space<vmem>>, vector<8x16xf32>
    %c0_18 = arith.constant 0 : index
    %c0_19 = arith.constant 0 : index
    %25 = vector.load %arg5[%c0_18, %c0_19] : memref<128x16xf32, #tpu.memory_space<vmem>>, vector<128x16xf32>
    %cst_20 = arith.constant dense<0.000000e+00> : vector<8x16xf32>
    %26 = tpu.matmul %23, %25, %cst_20 {dimension_numbers = #tpu.dot_dimension_numbers<[1], [0], [0], [1], [0, 0, 1, 1], [], []>, precision = #tpu.contract_precision<fp32>} : vector<8x128xf32>, vector<128x16xf32>, vector<8x16xf32> -> vector<8x16xf32>
    %27 = arith.addf %24, %26 : vector<8x16xf32>
    %c0_21 = arith.constant 0 : index
    %c0_22 = arith.constant 0 : index
    %28 = vector.load %arg9[%c0_21, %c0_22] : memref<8x16xf32, #tpu.memory_space<vmem>>, vector<8x16xf32>
    tpu.vector_store %arg9[%c0_21, %c0_22], %27 {strides = array<i32>} : memref<8x16xf32, #tpu.memory_space<vmem>>, vector<8x16xf32>,
    %cst_23 = arith.constant -1.000000e+01 : f32
    %29 = vector.broadcast %cst_23 : f32 to vector<8x128xf32>
    %30 = arith.select %21, %29, %18 : vector<8x128xi1>, vector<8x128xf32>
    %c0_24 = arith.constant 0 : index
    %c0_25 = arith.constant 0 : index
    %31 = vector.load %arg7[%c0_24, %c0_25] : memref<8x1xf32, #tpu.memory_space<vmem>>, vector<8x1xf32>
    %cst_26 = arith.constant dense<0xFF800000> : vector<8xf32>
    %32 = vector.multi_reduction <maximumf>, %30, %cst_26 [1] : vector<8x128xf32> to vector<8xf32>
    %33 = vector.shape_cast %32 : vector<8xf32> to vector<8x1xf32>
    %34 = arith.maximumf %31, %33 : vector<8x1xf32>
    %35 = arith.subf %31, %34 : vector<8x1xf32>
    %36 = math.exp %35 : vector<8x1xf32>
    %c0_27 = arith.constant 0 : index
    %c0_28 = arith.constant 0 : index
    %37 = vector.load %arg8[%c0_27, %c0_28] : memref<8x1xf32, #tpu.memory_space<vmem>>, vector<8x1xf32>
    %38 = arith.mulf %36, %37 : vector<8x1xf32>
    %39 = vector.broadcast %34 : vector<8x1xf32> to vector<8x128xf32>
    %40 = arith.subf %30, %39 : vector<8x128xf32>
    %41 = math.exp %40 : vector<8x128xf32>
    %cst_29 = arith.constant 0.000000e+00 : f32
    %42 = vector.broadcast %cst_29 : f32 to vector<8x128xf32>
    %43 = arith.select %21, %42, %41 : vector<8x128xi1>, vector<8x128xf32>
    %cst_30 = arith.constant dense<0.000000e+00> : vector<8xf32>
    %44 = vector.multi_reduction <add>, %43, %cst_30 [1] : vector<8x128xf32> to vector<8xf32>
    %45 = vector.shape_cast %44 : vector<8xf32> to vector<8x1xf32>
    %46 = arith.addf %38, %45 : vector<8x1xf32>
    %c0_31 = arith.constant 0 : index
    %c0_32 = arith.constant 0 : index
    %47 = vector.load %arg8[%c0_31, %c0_32] : memref<8x1xf32, #tpu.memory_space<vmem>>, vector<8x1xf32>
    tpu.vector_store %arg8[%c0_31, %c0_32], %46 {strides = array<i32>} : memref<8x1xf32, #tpu.memory_space<vmem>>, vector<8x1xf32>,
    %c0_33 = arith.constant 0 : index
    %c0_34 = arith.constant 0 : index
    %48 = vector.load %arg7[%c0_33, %c0_34] : memref<8x1xf32, #tpu.memory_space<vmem>>, vector<8x1xf32>
    tpu.vector_store %arg7[%c0_33, %c0_34], %34 {strides = array<i32>} : memref<8x1xf32, #tpu.memory_space<vmem>>, vector<8x1xf32>,
    %c0_i32_35 = arith.constant 0 : i32
    %49 = arith.cmpi eq, %arg1, %c0_i32_35 : i32
    %50 = arith.extui %49 : i1 to i32
    %c0_i32_36 = arith.constant 0 : i32
    %51 = arith.cmpi ne, %50, %c0_i32_36 : i32
    scf.if %51 {
      %c0_37 = arith.constant 0 : index
      %c0_38 = arith.constant 0 : index
      %52 = vector.load %arg9[%c0_37, %c0_38] : memref<8x16xf32, #tpu.memory_space<vmem>>, vector<8x16xf32>
      %c0_39 = arith.constant 0 : index
      %c0_40 = arith.constant 0 : index
      %53 = vector.load %arg7[%c0_39, %c0_40] : memref<8x1xf32, #tpu.memory_space<vmem>>, vector<8x1xf32>
      %54 = vector.broadcast %53 : vector<8x1xf32> to vector<8x16xf32>
      %55 = arith.subf %52, %54 : vector<8x16xf32>
      %56 = math.exp %55 : vector<8x16xf32>
      %c0_41 = arith.constant 0 : index
      %c0_42 = arith.constant 0 : index
      %57 = vector.load %arg8[%c0_41, %c0_42] : memref<8x1xf32, #tpu.memory_space<vmem>>, vector<8x1xf32>
      %58 = vector.broadcast %57 : vector<8x1xf32> to vector<8x16xf32>
      %59 = arith.addf %56, %58 : vector<8x16xf32>
      %60 = math.log %59 : vector<8x16xf32>
      %61 = arith.subf %55, %60 : vector<8x16xf32>
      %62 = vector.shape_cast %61 : vector<8x16xf32> to vector<1x8x16xf32>
      %cst_43 = arith.constant dense<0.000000e+00> : vector<1xf32>
      %63 = vector.multi_reduction <add>, %62, %cst_43 [1, 2] : vector<1x8x16xf32> to vector<1xf32>
      %64 = vector.shape_cast %63 : vector<1xf32> to vector<1x1x1xf32>
      %65 = vector.extract %64[0, 0, 0] : f32 from vector<1x1x1xf32>
      %c0_44 = arith.constant 0 : index
      %c0_45 = arith.constant 0 : index
      %66 = vector.load %arg10[%c0_44, %c0_45] : memref<8x1xf32, #tpu.memory_space<vmem>>, vector<8x1xf32>
      %67 = vector.shape_cast %66 : vector<8x1xf32> to vector<1x8x1xf32>
      %cst_46 = arith.constant dense<0.000000e+00> : vector<1xf32>
      %68 = vector.multi_reduction <add>, %67, %cst_46 [1, 2] : vector<1x8x1xf32> to vector<1xf32>
      %69 = vector.shape_cast %68 : vector<1xf32> to vector<1x1x1xf32>
      %70 = vector.extract %69[0, 0, 0] : f32 from vector<1x1x1xf32>
      %71 = tpu.iota {dimensions = array<i32: 1>} : vector<1x8x128xi32>
      %72 = tpu.iota {dimensions = array<i32: 2>} : vector<1x8x128xi32>
      %c0_i32_47 = arith.constant 0 : i32
      %73 = vector.broadcast %c0_i32_47 : i32 to vector<1x8x128xi32>
      %74 = arith.cmpi eq, %71, %73 : vector<1x8x128xi32>
      %c0_i32_48 = arith.constant 0 : i32
      %75 = vector.broadcast %c0_i32_48 : i32 to vector<1x8x128xi32>
      %76 = arith.cmpi eq, %72, %75 : vector<1x8x128xi32>
      %77 = arith.andi %74, %76 : vector<1x8x128xi1>
      %c0_i32_49 = arith.constant 0 : i32
      %78 = vector.broadcast %c0_i32_49 : i32 to vector<1x8x128xi32>
      %79 = arith.cmpi eq, %71, %78 : vector<1x8x128xi32>
      %c1_i32 = arith.constant 1 : i32
      %80 = vector.broadcast %c1_i32 : i32 to vector<1x8x128xi32>
      %81 = arith.cmpi eq, %72, %80 : vector<1x8x128xi32>
      %82 = arith.andi %79, %81 : vector<1x8x128xi1>
      %cst_50 = arith.constant 0.000000e+00 : f32
      %83 = vector.broadcast %70 : f32 to vector<1x8x128xf32>
      %84 = vector.broadcast %cst_50 : f32 to vector<1x8x128xf32>
      %85 = arith.select %82, %83, %84 : vector<1x8x128xi1>, vector<1x8x128xf32>
      %86 = vector.broadcast %65 : f32 to vector<1x8x128xf32>
      %87 = arith.select %77, %86, %85 : vector<1x8x128xi1>, vector<1x8x128xf32>
      %c0_51 = arith.constant 0 : index
      %c0_52 = arith.constant 0 : index
      %c0_53 = arith.constant 0 : index
      %88 = vector.load %arg6[%c0_51, %c0_52, %c0_53] : memref<1x8x128xf32, #tpu.memory_space<vmem>>, vector<1x8x128xf32>
      tpu.vector_store %arg6[%c0_51, %c0_52, %c0_53], %87 {strides = array<i32>} : memref<1x8x128xf32, #tpu.memory_space<vmem>>, vector<1x8x128xf32>,
    } else {
    }
    return
  }
  func.func @transform_0(%arg0: i32, %arg1: i32) -> (i32, i32) {
    %c0_i32 = arith.constant 0 : i32
    return %arg0, %arg1 : i32, i32
  }
  func.func @transform_1(%arg0: i32, %arg1: i32) -> (i32, i32) {
    %c0_i32 = arith.constant 0 : i32
    %c0_i32_0 = arith.constant 0 : i32
    return %arg0, %c0_i32 : i32, i32
  }
  func.func @transform_2(%arg0: i32, %arg1: i32) -> (i32, i32) {
    %c0_i32 = arith.constant 0 : i32
    %c0_i32_0 = arith.constant 0 : i32
    return %c0_i32, %arg1 : i32, i32
  }
  func.func @transform_3(%arg0: i32, %arg1: i32) -> (i32, i32) {
    %c0_i32 = arith.constant 0 : i32
    %c0_i32_0 = arith.constant 0 : i32
    %c0_i32_1 = arith.constant 0 : i32
    return %c0_i32, %c0_i32_0 : i32, i32
  }
  func.func @transform_4(%arg0: i32, %arg1: i32) -> (i32, i32, i32) {
    %c0_i32 = arith.constant 0 : i32
    %c0_i32_0 = arith.constant 0 : i32
    %c0_i32_1 = arith.constant 0 : i32
    return %arg0, %c0_i32, %c0_i32_0 : i32, i32, i32
  }
}

</mosaic_0001>

<bundles_post_ra>
// kernel: tpu_custom_call.1
= control target key start
LH: loop header
LB: loop body
LE: loop exit
PB: predicated region body
PF: predicated region fallthrough
CT: control target
= control target key end

     0   :  { %v1385_v1 = vmov 0.0   ;;  %vm1386_vm0 = vmmov 0   ;;  %v1387_v9 = vmov 0.0|0.0   ;;  %s1820_s0 = inlined_call_operand.vmem [shape: bf16[8,128], index: 0, kind: input, shape index: {}]   ;;  %s1821_s1 = inlined_call_operand.vmem [shape: bf16[8,32], index: 1, kind: input, shape index: {}]   ;;  %s1822_s2 = inlined_call_operand.vmem [shape: bf16[32,128], index: 2, kind: input, shape index: {}]   ;;  %s1823_s3 = inlined_call_operand.vmem [shape: f32[128,16], index: 3, kind: input, shape index: {}]   ;;  %s1824_s4 = inlined_call_operand.hbm [shape: f32[1,8,128], index: 4, kind: output, shape index: {}]  }
   0x1   :  { %v1349_v0 = vld [vmem:[%s1822_s2] sm:$0xff]   ;;  %975 = vmatprep.subr.bf16.mxu0 %v1385_v1  ;;  %v1350_v2 = vld [vmem:[%s1822_s2 + $0x8] sm:$0xff]   ;;  %979 = vmatprep.mubr.msk.bf16.mxu0 %vm1386_vm0, %v1385_v1  ;;  %v1435_v7 = vld [vmem:[%s1823_s3 + $0x10] sm:$0xff] }
   0x2   :  { %976 = vmatpush3.bf16.msra.mxu0 %v1349_v0  ;;  %v111_v3 = vld [vmem:[%s1823_s3] sm:$0xff]  ;;  %v112_v4 = vld [vmem:[%s1823_s3 + $0x8] sm:$0xff]  ;;  %v1440_v8 = vld [vmem:[%s1823_s3 + $0x18] sm:$0xff]  ;;  %1193 = vmatprep.subr.bf16.mxu1 %v1387_v9  ;;  %v134_v11 = vand.u32 4294901760, %v1435_v7 }
   0x3   :  { %977 = vmatprep.subr.bf16.mxu0 %v1385_v1  ;;  %v128_v5 = vand.u32 4294901760, %v111_v3  ;;  %v131_v6 = vand.u32 4294901760, %v112_v4  ;;  %v1446_v10 = vld [vmem:[%s1823_s3 + $0x20] sm:$0xff]  ;;  %v137_v12 = vand.u32 4294901760, %v1440_v8  ;;  %v1453_v13 = vld [vmem:[%s1823_s3 + $0x28] sm:$0xff]  ;;  %1015 = vmatprep.mubr.msk.f32.mxu1 %vm1386_vm0, %v1385_v1 }
   0x4   :  { %v140_v14 = vand.u32 4294901760, %v1446_v10 }
   0x5   :  { %9 = vsyncpa [#allocation7], 0  ;;  %v1458_v15 = vsub.f32 %v111_v3, %v128_v5  ;;  %v1460_v16 = vsub.f32 %v112_v4, %v131_v6  ;;  %v1462_v17 = vpack.c.bf16 %v131_v6, %v128_v5  ;;  %v143_v18 = vand.u32 4294901760, %v1453_v13  ;;  %v32_v19 = vld [vmem:[%s1821_s1] sm:$0xf]  ;;  %v117_v45 = vld [vmem:[%s1823_s3 + $0x30] sm:$0xff] }
   0x6   :  { %978 = vmatpush3.bf16.msra.mxu0 %v1350_v2  ;;  %vm49_vm1 = vcmask 261120   ;;  %v1471_v20 = vsub.f32 %v1435_v7, %v134_v11  ;;  %v1476_v21 = vsub.f32 %v1440_v8, %v137_v12  ;;  %v1481_v22 = vsub.f32 %v1446_v10, %v140_v14  ;;  %v118_v46 = vld [vmem:[%s1823_s3 + $0x38] sm:$0xff]  ;;  %v119_v51 = vld [vmem:[%s1823_s3 + $0x40] sm:$0xff]  ;;  %v120_v52 = vld [vmem:[%s1823_s3 + $0x48] sm:$0xff]  ;;  %s1390_s25 = smov [#allocation6]  }
   0x7   :  { %1217 = vmatprep.subr.bf16.mxu0 %v1387_v9  ;;  %v221_v23 = vand.u32 4294901760, %v1458_v15  ;;  %v228_v24 = vand.u32 4294901760, %v1460_v16  ;;  %1195 = vmatpush3.bf16.msra.mxu1 %v1462_v17  ;;  %v1490_v25 = vsub.f32 %v1453_v13, %v143_v18  ;;  %v146_v47 = vand.u32 4294901760, %v117_v45  ;;  %v1551_v61 = vld [vmem:[%s1823_s3 + $0x50] sm:$0xff]  ;;  %v122_v62 = vld [vmem:[%s1823_s3 + $0x58] sm:$0xff]  ;;  %v1579_v7 = vld [vmem:[%s1823_s3 + $0x60] sm:$0xff] }
   0x8   :  { %v235_v26 = vand.u32 4294901760, %v1471_v20  ;;  %v242_v27 = vand.u32 4294901760, %v1476_v21  ;;  %v249_v28 = vand.u32 4294901760, %v1481_v22  ;;  %1196 = vmatprep.subr.bf16.mxu1 %v1387_v9  ;;  %v149_v48 = vand.u32 4294901760, %v118_v46  ;;  %v124_v8 = vld [vmem:[%s1823_s3 + $0x68] sm:$0xff]  ;;  %v125_v10 = vld [vmem:[%s1823_s3 + $0x70] sm:$0xff] }
   0x9   :  { %980 = vmatmul.mubr.msk.bf16.vlgmr.msra.gmra.mrb[0].mxu0 %vm49_vm1, %v32_v19  ;;  %v222_v29 = vsub.f32 %v1458_v15, %v221_v23  ;;  %v229_v30 = vsub.f32 %v1460_v16, %v228_v24  ;;  %v256_v31 = vand.u32 4294901760, %v1490_v25  ;;  %v1526_v49 = vsub.f32 %v117_v45, %v146_v47  ;;  %v126_v13 = vld [vmem:[%s1823_s3 + $0x78] sm:$0xff]  ;;  %s859_s26 = sshll.u32 %s1390_s25, 4  ;;  %s860_s26 = int_to_ptr.vmem [resolvable:$true] %s859_s26 }
   0xa   :  { %v236_v32 = vsub.f32 %v1471_v20, %v235_v26  ;;  %v243_v33 = vsub.f32 %v1476_v21, %v242_v27  ;;  %1050 = vmatprep.mubr.msk.f32.mxu0 %vm1386_vm0, %v1385_v1  ;;  %v250_v36 = vsub.f32 %v1481_v22, %v249_v28  ;;  %v1528_v50 = vsub.f32 %v118_v46, %v149_v48  ;;  %s1361_s28 = scalar_lea.vmem %s860_s26, 128  ;;  %p1366_p1 = scmp.lt.s32.totalorder %s860_s26, %s860_s26 }
   0xb   :  { %v223_v34 = vand.u32 4294901760, %v222_v29  ;;  %v230_v35 = vand.u32 4294901760, %v229_v30  ;;  %v257_v37 = vsub.f32 %v1490_v25, %v256_v31  ;;  %v263_v53 = vand.u32 4294901760, %v1526_v49  ;;  %p1362_p0 = scmp.ne.s32.totalorder %s860_s26, %s1361_s28  ;;  %p1367_p2 = scmp.lt.s32.totalorder %s1361_s28, %s1361_s28 }
   0xc   :  { %v237_v38 = vand.u32 4294901760, %v236_v32  ;;  %v244_v39 = vand.u32 4294901760, %v243_v33  ;;  %v251_v42 = vand.u32 4294901760, %v250_v36  ;;  %v270_v54 = vand.u32 4294901760, %v1528_v50 }
   0xd   :  { %v1218_v40 = vpack.c.bf16 %v230_v35, %v223_v34  ;;  %v258_v43 = vand.u32 4294901760, %v257_v37  ;;  %v152_v55 = vand.u32 4294901760, %v119_v51  ;;  %v155_v56 = vand.u32 4294901760, %v120_v52  ;;  %p1368_p3 = por %p1367_p2, %p1366_p1 }
   0xe   :  { %v1221_v41 = vpack.c.bf16 %v244_v39, %v237_v38  ;;  %v264_v57 = vsub.f32 %v1526_v49, %v263_v53  ;;  %v271_v58 = vsub.f32 %v1528_v50, %v270_v54  ;;  %v158_v4 = vand.u32 4294901760, %v1551_v61 }
   0xf   :  { %1219 = vmatpush3.bf16.msra.mxu0 %v1218_v40  ;;  %v1224_v44 = vpack.c.bf16 %v258_v43, %v251_v42  ;;  %v1544_v59 = vsub.f32 %v119_v51, %v152_v55  ;;  %v1546_v60 = vsub.f32 %v120_v52, %v155_v56  ;;  %v161_v5 = vand.u32 4294901760, %v122_v62  ;;  %p1369_p4 = pnand %p1368_p3, %p1362_p0 }
  0x10   :  { %1220 = vmatprep.subr.bf16.mxu0 %v1387_v9  ;;  %v265_v63 = vand.u32 4294901760, %v264_v57  ;;  %v272_v0 = vand.u32 4294901760, %v271_v58  ;;  %v1563_v6 = vpack.c.bf16 %v137_v12, %v134_v11  ;;  %v1572_v32 = vsub.f32 %v1551_v61, %v158_v4 }
  0x11   :  { %v277_v2 = vand.u32 4294901760, %v1544_v59  ;;  %v284_v3 = vand.u32 4294901760, %v1546_v60  ;;  %v1574_v33 = vsub.f32 %v122_v62, %v161_v5  ;;  %v164_v34 = vand.u32 4294901760, %v1579_v7 }
  0x12   :  { %v1227_v19 = vpack.c.bf16 %v272_v0, %v265_v63  ;;  %1198 = vmatpush3.bf16.msra.mxu1 %v1563_v6  ;;  %v167_v35 = vand.u32 4294901760, %v124_v8  ;;  %v291_v36 = vand.u32 4294901760, %v1572_v32  ;;  %v1594_v38 = vpack.c.bf16 %v143_v18, %v140_v14 }
  0x13   :  { %1222 = vmatpush3.bf16.msra.mxu0 %v1221_v41  ;;  %v278_v29 = vsub.f32 %v1544_v59, %v277_v2  ;;  %v285_v30 = vsub.f32 %v1546_v60, %v284_v3  ;;  %1199 = vmatprep.subr.bf16.mxu1 %v1387_v9  ;;  %v298_v37 = vand.u32 4294901760, %v1574_v33  ;;  %v1597_v40 = vsub.f32 %v1579_v7, %v164_v34 }
  0x14   :  { %1223 = vmatprep.subr.bf16.mxu0 %v1387_v9  ;;  %v1599_v41 = vsub.f32 %v124_v8, %v167_v35  ;;  %v292_v42 = vsub.f32 %v1572_v32, %v291_v36  ;;  %v1614_v14 = vpack.c.bf16 %v149_v48, %v146_v47  ;;  %v170_v51 = vand.u32 4294901760, %v125_v10 }
  0x15   :  { %v279_v11 = vand.u32 4294901760, %v278_v29  ;;  %v286_v12 = vand.u32 4294901760, %v285_v30  ;;  %v299_v43 = vsub.f32 %v1574_v33, %v298_v37  ;;  %v305_v18 = vand.u32 4294901760, %v1597_v40 }
  0x16   :  { %1201 = vmatpush3.bf16.msra.mxu1 %v1594_v38  ;;  %v293_v45 = vand.u32 4294901760, %v292_v42  ;;  %v173_v48 = vand.u32 4294901760, %v126_v13  ;;  %v1626_v58 = vsub.f32 %v125_v10, %v170_v51  ;;  %v1629_v61 = vpack.c.bf16 %v155_v56, %v152_v55 }
  0x17   :  { %1225 = vmatpush3.bf16.msra.mxu0 %v1224_v44  ;;  %v1230_v39 = vpack.c.bf16 %v286_v12, %v279_v11  ;;  %v312_v44 = vand.u32 4294901760, %v1599_v41  ;;  %1202 = vmatprep.subr.bf16.mxu1 %v1387_v9  ;;  %v300_v46 = vand.u32 4294901760, %v299_v43  ;;  %v306_v52 = vsub.f32 %v1597_v40, %v305_v18 }
  0x18   :  { %1226 = vmatprep.subr.bf16.mxu0 %v1387_v9  ;;  %v1631_v0 = vsub.f32 %v126_v13, %v173_v48  ;;  %v1641_v55 = vpack.c.bf16 %v161_v5, %v158_v4  ;;  %v1388_v12 = vmov 0   ;;  %v1650_v4 = vpack.c.bf16 %v167_v35, %v164_v34 }
  0x19   :  { %v313_v47 = vsub.f32 %v1599_v41, %v312_v44  ;;  %v1233_v57 = vpack.c.bf16 %v300_v46, %v293_v45  ;;  %v307_v62 = vand.u32 4294901760, %v306_v52  ;;  %1347 = vset.pattern.permute.xlu0 %v1388_v12  ;;  %1348 = vset.pattern.permute.xlu1 %v1388_v12  ;;  %v1655_v5 = vpack.c.bf16 %v173_v48, %v170_v51  ;;  %v104_v52 = vld [vmem:[%s1820_s0] sm:$0xf] }
  0x1a   :  { %1204 = vmatpush3.bf16.msra.mxu1 %v1614_v14  ;;  %v326_v30 = vand.u32 4294901760, %v1631_v0  ;;  %v1251_v42 = vpack.c.bf16 %v1528_v50, %v1526_v49  ;;  %v1254_v43 = vpack.c.bf16 %v1546_v60, %v1544_v59  ;;  %v1257_v34 = vpack.c.bf16 %v1574_v33, %v1572_v32 }
  0x1b   :  { %1228 = vmatpush3.bf16.msra.mxu0 %v1227_v19  ;;  %v314_v63 = vand.u32 4294901760, %v313_v47  ;;  %1205 = vmatprep.subr.bf16.mxu1 %v1387_v9  ;;  %v319_v19 = vand.u32 4294901760, %v1626_v58  ;;  %v1260_v35 = vpack.c.bf16 %v1599_v41, %v1597_v40  ;;  %v1263_v10 = vpack.c.bf16 %v1631_v0, %v1626_v58 }
  0x1c   :  { %1229 = vmatprep.subr.bf16.mxu0 %v1387_v9  ;;  %v327_v56 = vsub.f32 %v1631_v0, %v326_v30  ;;  %vm105_vm2 = vcmp.gt.bf16.partialorder %v104_v52, 1056980736  ;;  %vm26_vm4 = vcmask 7168   ;;  %vm29_vm5 = vcmask 130048  }
  0x1d   :  { %v1236_v29 = vpack.c.bf16 %v314_v63, %v307_v62  ;;  %v320_v7 = vsub.f32 %v1626_v58, %v319_v19  ;;  %28 = vst.msk [vmem:[#allocation3] sm:$0xff] %vm26_vm4, %v1385_v1  ;;  %31 = vst.msk [vmem:[#allocation5] sm:$0xff] %vm26_vm4, %v1385_v1 }
  0x1e   :  { %1207 = vmatpush3.bf16.msra.mxu1 %v1629_v61  ;;  %v328_v11 = vand.u32 4294901760, %v327_v56  ;;  %30 = vst.msk [vmem:[#allocation4] sm:$0xff] %vm29_vm5, %v1385_v1 }
  0x1f   :  { %1231 = vmatpush3.bf16.msra.mxu0 %v1230_v39  ;;  %1208 = vmatprep.subr.bf16.mxu1 %v1387_v9  ;;  %v321_v8 = vand.u32 4294901760, %v320_v7 }
  0x20   :  { %1232 = vmatprep.subr.bf16.mxu0 %v1387_v9 }
  0x21   :  { %v1239_v39 = vpack.c.bf16 %v328_v11, %v321_v8 }
  0x22   :  { %1210 = vmatpush3.bf16.msra.mxu1 %v1641_v55 }
  0x23   :  { %1234 = vmatpush3.bf16.msra.mxu0 %v1233_v57  ;;  %1211 = vmatprep.subr.bf16.mxu1 %v1387_v9  ;;  %v106_v57 = vsel %vm105_vm2, 65537, %v1388_v12 }
  0x24   :  { %1235 = vmatprep.subr.bf16.mxu0 %v1387_v9  ;;  %v107_v62 = vunpack.c.l.b16 %v106_v57 }
  0x26   :  { %1213 = vmatpush3.bf16.msra.mxu1 %v1650_v4  ;;  %vm1675_vm3 = vcmp.ne.s32.totalorder %v107_v62, 0 }
  0x27   :  { %1237 = vmatpush3.bf16.msra.mxu0 %v1236_v29  ;;  %1214 = vmatprep.subr.bf16.mxu1 %v1387_v9 }
  0x28   :  { %1238 = vmatprep.subr.bf16.mxu0 %v1387_v9 }
  0x2a   :  { %1216 = vmatpush3.bf16.msra.mxu1 %v1655_v5 }
  0x2b   :  { %1240 = vmatpush3.bf16.msra.mxu0 %v1239_v39  ;;  %1241 = vmatprep.subr.bf16.mxu1 %v1387_v9 }
  0x2c   :  { %1265 = vmatprep.subr.bf16.mxu0 %v1387_v9 }
  0xdc   :  { %v87_v13 = vpop.f32.mrb[0].mxu0 }
  0xdd   :  { %v1669_v45 = vmul.f32 0.17677669, %v87_v13  ;;  %v981_v46 = vpop.f32.mrb[1].mxu0 }
  0xde   :  { %v90_v51 = vpop.f32.mrb[2].mxu0  ;;  %v1242_v46 = vpack.c.bf16 %v1460_v16, %v1458_v15  ;;  %v1296_v15 = vpack.c.bf16 %v256_v31, %v249_v28  ;;  %v1299_v16 = vpack.c.bf16 %v270_v54, %v263_v53 }
  0xdf   :  { %v101_v47 = vmul.f32 0.1, %v1669_v45  ;;  %v982_v48 = vpop.f32.mrb[3].mxu0  ;;  %v1389_v51 = vmov -10.0   ;;  %v95_v0 = vmul.f32 %v1669_v45, %v1669_v45 }
  0xe0   :  { %27 = vst.msk [vmem:[#allocation2] sm:$0xff] %vm26_vm4, %v1389_v51  ;;  %v1248_v48 = vpack.c.bf16 %v1490_v25, %v1481_v22  ;;  %v1308_v22 = vpack.c.bf16 %v312_v44, %v305_v18  ;;  %v110_v18 = vld [vmem:[#allocation4] sm:$0xff] }
  0xe1   :  { %1351 = vtanh.f32 %v101_v47  ;;  %v1245_v47 = vpack.c.bf16 %v1476_v21, %v1471_v20  ;;  %v1302_v20 = vpack.c.bf16 %v284_v3, %v277_v2  ;;  %v1305_v21 = vpack.c.bf16 %v298_v37, %v291_v36 }
  0xeb   :  { %v1352_v63 = vpop.eup %1351 }
  0xec   :  { %v103_v7 = vmul.f32 10.0, %v1352_v63 }
  0xee   :  { %v1681_v56 = vsel %vm1675_vm3, -10.0, %v103_v7  ;;  %v109_v8 = vsel %vm1675_vm3, %v103_v7, 0.0 }
  0xef   :  { %773 = vmax.xlane.f32.xlu0 %v1681_v56  ;;  %v1686_v11 = vand.u32 4294901760, %v109_v8 }
  0xf1   :  { %v209_v12 = vsub.f32 %v109_v8, %v1686_v11  ;;  %1051 = vmatmul.mubr.f32.vlgmr.msra.gmra.mrb[4].mxu0 %v1686_v11 }
  0xf2   :  { %1267 = vmatpush3.bf16.msra.mxu0 %v1462_v17  ;;  %1120 = vmatprep.mubr.msk.f32.mxu0 %vm1386_vm0, %v1385_v1 }
  0xf3   :  { %1268 = vmatprep.subr.bf16.mxu0 %v1387_v9  ;;  %v210_v39 = vand.u32 4294901760, %v209_v12 }
  0xf5   :  { %v211_v13 = vsub.f32 %v209_v12, %v210_v39 }
  0xf6   :  { %1270 = vmatpush3.bf16.msra.mxu0 %v1563_v6 }
  0xf7   :  { %1271 = vmatprep.subr.bf16.mxu0 %v1387_v9  ;;  %v212_v52 = vand.u32 4294901760, %v211_v13 }
  0xf9   :  { %1016 = vmatmul.mubr.f32.vlgmr.msra.gmra.mrb[0].mxu1 %v212_v52 }
  0xfa   :  { %1243 = vmatpush3.bf16.msra.mxu1 %v1242_v46  ;;  %1273 = vmatpush3.bf16.msra.mxu0 %v1594_v38 }
  0xfb   :  { %1244 = vmatprep.subr.bf16.mxu1 %v1387_v9  ;;  %1274 = vmatprep.subr.bf16.mxu0 %v1387_v9 }
  0xfc   :  { %1085 = vmatprep.mubr.msk.f32.mxu1 %vm1386_vm0, %v1385_v1 }
  0xfe   :  { %1246 = vmatpush3.bf16.msra.mxu1 %v1245_v47  ;;  %1276 = vmatpush3.bf16.msra.mxu0 %v1614_v14 }
  0xff   :  { %1247 = vmatprep.subr.bf16.mxu1 %v1387_v9  ;;  %1277 = vmatprep.subr.bf16.mxu0 %v1387_v9 }
 0x102   :  { %1249 = vmatpush3.bf16.msra.mxu1 %v1248_v48  ;;  %1279 = vmatpush3.bf16.msra.mxu0 %v1629_v61 }
 0x103   :  { %1250 = vmatprep.subr.bf16.mxu1 %v1387_v9  ;;  %1280 = vmatprep.subr.bf16.mxu0 %v1387_v9 }
 0x106   :  { %1252 = vmatpush3.bf16.msra.mxu1 %v1251_v42  ;;  %1282 = vmatpush3.bf16.msra.mxu0 %v1641_v55  ;;  %v1290_v42 = vpack.c.bf16 %v228_v24, %v221_v23  ;;  %v1311_v23 = vpack.c.bf16 %v326_v30, %v319_v19  ;;  %v772_v24 = vld [vmem:[#allocation2] sm:$0xff] }
 0x107   :  { %1253 = vmatprep.subr.bf16.mxu1 %v1387_v9  ;;  %1283 = vmatprep.subr.bf16.mxu0 %v1387_v9 }
 0x10a   :  { %1255 = vmatpush3.bf16.msra.mxu1 %v1254_v43  ;;  %1285 = vmatpush3.bf16.msra.mxu0 %v1650_v4 }
 0x10b   :  { %1256 = vmatprep.subr.bf16.mxu1 %v1387_v9  ;;  %1286 = vmatprep.subr.bf16.mxu0 %v1387_v9 }
 0x10e   :  { %1258 = vmatpush3.bf16.msra.mxu1 %v1257_v34  ;;  %1288 = vmatpush3.bf16.msra.mxu0 %v1655_v5 }
 0x10f   :  { %1259 = vmatprep.subr.bf16.mxu1 %v1387_v9  ;;  %1313 = vmatprep.subr.bf16.mxu0 %v1387_v9 }
 0x111   :  { %1121 = vmatmul.mubr.f32.vlgmr.msra.gmra.mrb[6].mxu0 %v210_v39 }
 0x112   :  { %1261 = vmatpush3.bf16.msra.mxu1 %v1260_v35  ;;  %1315 = vmatpush3.bf16.msra.mxu0 %v1462_v17  ;;  %v1293_v17 = vpack.c.bf16 %v242_v27, %v235_v26 }
 0x113   :  { %1262 = vmatprep.subr.bf16.mxu1 %v1387_v9  ;;  %1316 = vmatprep.subr.bf16.mxu0 %v1387_v9 }
 0x114   :  { %1190 = vmatprep.mubr.msk.f32.mxu0 %vm1386_vm0, %v1385_v1 }
 0x116   :  { %1264 = vmatpush3.bf16.msra.mxu1 %v1263_v10  ;;  %1318 = vmatpush3.bf16.msra.mxu0 %v1563_v6  ;;  %v94_v10 = vld [vmem:[#allocation5] sm:$0xff] }
 0x117   :  { %1289 = vmatprep.subr.bf16.mxu1 %v1387_v9  ;;  %1319 = vmatprep.subr.bf16.mxu0 %v1387_v9 }
 0x119   :  { %1086 = vmatmul.mubr.f32.vlgmr.msra.gmra.mrb[2].mxu1 %v209_v12 }
 0x11a   :  { %1291 = vmatpush3.bf16.msra.mxu1 %v1290_v42  ;;  %1321 = vmatpush3.bf16.msra.mxu0 %v1594_v38 }
 0x11b   :  { %1292 = vmatprep.subr.bf16.mxu1 %v1387_v9  ;;  %1322 = vmatprep.subr.bf16.mxu0 %v1387_v9 }
 0x11c   :  { %1155 = vmatprep.mubr.msk.f32.mxu1 %vm1386_vm0, %v1385_v1 }
 0x11e   :  { %1294 = vmatpush3.bf16.msra.mxu1 %v1293_v17  ;;  %1324 = vmatpush3.bf16.msra.mxu0 %v1614_v14 }
 0x11f   :  { %1295 = vmatprep.subr.bf16.mxu1 %v1387_v9  ;;  %1325 = vmatprep.subr.bf16.mxu0 %v1387_v9 }
 0x122   :  { %1297 = vmatpush3.bf16.msra.mxu1 %v1296_v15  ;;  %1327 = vmatpush3.bf16.msra.mxu0 %v1629_v61 }
 0x123   :  { %1298 = vmatprep.subr.bf16.mxu1 %v1387_v9  ;;  %1328 = vmatprep.subr.bf16.mxu0 %v1387_v9 }
 0x126   :  { %1300 = vmatpush3.bf16.msra.mxu1 %v1299_v16  ;;  %1330 = vmatpush3.bf16.msra.mxu0 %v1641_v55  ;;  %v779_v55 = vld [vmem:[#allocation3] sm:$0xff] }
 0x127   :  { %1301 = vmatprep.subr.bf16.mxu1 %v1387_v9  ;;  %1331 = vmatprep.subr.bf16.mxu0 %v1387_v9 }
 0x12a   :  { %1303 = vmatpush3.bf16.msra.mxu1 %v1302_v20  ;;  %1333 = vmatpush3.bf16.msra.mxu0 %v1650_v4 }
 0x12b   :  { %1304 = vmatprep.subr.bf16.mxu1 %v1387_v9  ;;  %1334 = vmatprep.subr.bf16.mxu0 %v1387_v9 }
 0x12e   :  { %1306 = vmatpush3.bf16.msra.mxu1 %v1305_v21  ;;  %1336 = vmatpush3.bf16.msra.mxu0 %v1655_v5 }
 0x12f   :  { %1307 = vmatprep.subr.bf16.mxu1 %v1387_v9 }
 0x131   :  { %1191 = vmatmul.mubr.f32.vlgmr.msra.gmra.mrb[8].mxu0 %v1686_v11 }
 0x132   :  { %1309 = vmatpush3.bf16.msra.mxu1 %v1308_v22 }
 0x133   :  { %1310 = vmatprep.subr.bf16.mxu1 %v1387_v9 }
 0x136   :  { %1312 = vmatpush3.bf16.msra.mxu1 %v1311_v23 }
 0x139   :  { %1156 = vmatmul.mubr.f32.vlgmr.msra.gmra.mrb[4].mxu1 %v1686_v11 }
 0x17c   :  { %v774_v25 = vpop.xlane.xlu0 %773 }
 0x17d   :  { %v775_v26 = vmax.f32 %v772_v24, %v774_v25 }
 0x17f   :  { %v776_v27 = vsub.f32 %v772_v24, %v775_v26  ;;  %794 = vst.msk [vmem:[#allocation2] sm:$0xff] %vm26_vm4, %v775_v26  ;;  %783 = vperm.xlu0 %1347, %v775_v26  }
 0x181   :  { %v777_v19 = vmul.f32 1.442695, %v776_v27  ;;  %v839_v27 = vlaneseq }
 0x186   :  { %v799_v61 = vld [vmem:[#allocation2] sm:$0xff] }
 0x1c4   :  { %v365_v28 = vpop.f32.mrb[4].mxu0 }
 0x1c5   :  { %v1052_v31 = vpop.f32.mrb[5].mxu0 }
 0x1c6   :  { %v842_v31 = vand.u32 127, %v839_v27 }
 0x1c8   :  { %vm846_vm7 = vcmp.eq.s32.totalorder %v842_v31, 1  ;;  %vm844_vm8 = vcmp.eq.s32.totalorder %v842_v31, 0 }
 0x1cc   :  { %v214_v49 = vpop.f32.mrb[0].mxu1 }
 0x1cd   :  { %v366_v50 = vadd.f32 %v365_v28, %v214_v49  ;;  %v1017_v53 = vpop.f32.mrb[1].mxu1  ;;  %v840_v28 = vshrl.u32 %v839_v27, 7 }
 0x1cf   :  { %vm843_vm6 = vcmp.eq.s32.totalorder %v840_v28, 0 }
 0x1d0   :  { %vm847_vm9 = vmand %vm843_vm6, %vm846_vm7 }
 0x1d1   :  { %vm845_vm10 = vmand %vm843_vm6, %vm844_vm8 }
 0x1e4   :  { %v558_v9 = vpop.f32.mrb[6].mxu0 }
 0x1e5   :  { %v1122_v54 = vpop.f32.mrb[7].mxu0 }
 0x1ec   :  { %v469_v59 = vpop.f32.mrb[2].mxu1 }
 0x1ed   :  { %v470_v60 = vadd.f32 %v469_v59, %v366_v50  ;;  %v1087_v2 = vpop.f32.mrb[3].mxu1 }
 0x1ef   :  { %v559_v3 = vadd.f32 %v558_v9, %v470_v60 }
 0x1fe   :  { %v784_v6 = vpop.permute.xlu0 %783 }
 0x1ff   :  { %v786_v32 = vsub.f32 %v1681_v56, %v784_v6 }
 0x201   :  { %v787_v33 = vmul.f32 1.442695, %v786_v32 }
 0x203   :  { %1353 = vpow2.f32 %v787_v33 }
 0x204   :  { %v764_v36 = vpop.f32.mrb[8].mxu0  ;;  %1355 = vpow2.f32 %v777_v19 }
 0x205   :  { %v1192_v37 = vpop.f32.mrb[9].mxu0 }
 0x20c   :  { %v677_v38 = vpop.f32.mrb[4].mxu1 }
 0x20d   :  { %v1354_v1 = vpop.eup %1353  ;;  %v678_v40 = vadd.f32 %v677_v38, %v559_v3  ;;  %v1157_v41 = vpop.f32.mrb[5].mxu1 }
 0x20e   :  { %v789_v14 = vsel %vm1675_vm3, 0.0, %v1354_v1  ;;  %v1356_v30 = vpop.eup %1355 }
 0x20f   :  { %v765_v44 = vadd.f32 %v764_v36, %v678_v40  ;;  %790 = vadd.xlane.f32.xlu1 %v789_v14  ;;  %v780_v4 = vmul.f32 %v1356_v30, %v779_v55 }
 0x211   :  { %v768_v58 = vadd.f32 %v765_v44, %v110_v18 }
 0x213   :  { %770 = vst.msk [vmem:[#allocation4] sm:$0xff] %vm29_vm5, %v768_v58 }
 0x21a   :  { %v798_v29 = vld [vmem:[#allocation4] sm:$0xff] }
 0x220   :  { %802 = vperm.xlu1 %1348, %v799_v61  }
 0x244   :  { %96 = vadd.xlane.f32.xlu1 %v95_v0 }
 0x29c   :  { %v791_v5 = vpop.xlane.xlu1 %790 }
 0x29d   :  { %v792_v43 = vadd.f32 %v791_v5, %v780_v4 }
 0x29f   :  { %793 = vst.msk [vmem:[#allocation3] sm:$0xff] %vm26_vm4, %v792_v43 }
 0x2a0   :  { %v803_v35 = vpop.permute.xlu1 %802 }
 0x2a1   :  { %v805_v7 = vsub.f32 %v798_v29, %v803_v35 }
 0x2a3   :  { %v806_v56 = vmul.f32 1.442695, %v805_v7 }
 0x2a5   :  { %1357 = vpow2.f32 %v806_v56 }
 0x2a6   :  { %v808_v34 = vld [vmem:[#allocation3] sm:$0xff] }
 0x2a7   :  { %811 = vperm.xlu0 %1347, %v808_v34  }
 0x2af   :  { %v1358_v8 = vpop.eup %1357 }
 0x2d1   :  { %v97_v57 = vpop.xlane.xlu1 %96 }
 0x2d2   :  { %v98_v62 = vadd.f32 %v97_v57, %v94_v10 }
 0x2d4   :  { %100 = vst.msk [vmem:[#allocation5] sm:$0xff] %vm26_vm4, %v98_v62 }
 0x2db   :  { %v828_v63 = vld [vmem:[#allocation5] sm:$0xff] }
 0x2dc   :  { %v829_v45 = vsel %vm26_vm4, %v828_v63, 0.0 }
 0x2dd   :  { %830 = vadd.xlane.f32.xlu1 %v829_v45 }
 0x326   :  { %v812_v11 = vpop.permute.xlu0 %811 }
 0x327   :  { %v814_v12 = vadd.f32 %v1358_v8, %v812_v11 }
 0x329   :  { %1359 = vlog2.f32 %v814_v12 }
 0x333   :  { %v1360_v39 = vpop.eup %1359 }
 0x334   :  { %v816_v13 = vmul.f32 0.6931472, %v1360_v39 }
 0x336   :  { %v817_v46 = vsub.f32 %v805_v7, %v816_v13 }
 0x338   :  { %v818_v51 = vsel %vm29_vm5, %v817_v46, 0.0 }
 0x339   :  { %819 = vadd.xlane.f32.xlu0 %v818_v51 }
 0x36a   :  { %v831_v52 = vpop.xlane.xlu1 %830 }
 0x36b   :  { %v832_v47 = vrot.slane %v831_v52, 4 }
 0x36d   :  { %v833_v48 = vadd.f32 %v832_v47, %v831_v52 }
 0x36f   :  { %v834_v42 = vrot.slane %v833_v48, 2 }
 0x371   :  { %v835_v20 = vadd.f32 %v834_v42, %v833_v48 }
 0x373   :  { %v836_v23 = vrot.slane %v835_v20, 1 }
 0x375   :  { %v837_v26 = vadd.f32 %v836_v23, %v835_v20 }
 0x3c6   :  { %v820_v17 = vpop.xlane.xlu0 %819 }
 0x3c7   :  { %v821_v15 = vrot.slane %v820_v17, 4 }
 0x3c9   :  { %v822_v16 = vadd.f32 %v821_v15, %v820_v17 }
 0x3cb   :  { %v823_v21 = vrot.slane %v822_v16, 2 }
 0x3cd   :  { %v824_v22 = vadd.f32 %v823_v21, %v822_v16 }
 0x3cf   :  { %v825_v24 = vrot.slane %v824_v22, 1 }
 0x3d1   :  { %v826_v25 = vadd.f32 %v825_v24, %v824_v22 }
 0x3d3   :  { %1337 = vpush %v826_v25 }
 0x3d4   :  { %1339 = vpush %v837_v26 }
 0x404   :  { %s1338_s0 = spop %1337 }
 0x405   :  { %v850_v49 = vstv %s1338_s0  ;;  %s1340_s27 = spop %1339 }
 0x406   :  { %v848_v50 = vstv %s1340_s27 }
 0x407   :  { %v849_v53 = vsel %vm847_vm9, %v848_v50, 0.0 }
 0x408   :  { %v851_v9 = vsel %vm845_vm10, %v850_v49, %v849_v53 }
 0x409   :  { %852 = vst [vmem:[#allocation6] sm:$0xff] %v851_v9 }
 0x40a   :  { %1372 = shalt.err (!%p1369_p4)
}
 0x40b   :  { %s1373_s5 = scalar_lea.hbm %s1824_s4, 128 }
 0x40c   :  { %p1374_p5 = scmp.ne.s32.totalorder %s1824_s4, %s1373_s5  ;;  %p1377_p6 = scmp.lt.u32.totalorder %s1373_s5, %s1824_s4 }
 0x40e   :  { %p1379_p7 = pnand %p1377_p6, %p1374_p5 }
 0x410   :  { %1382 = shalt.err (!%p1379_p7)
}
 0x411   :  { %862 = dma.vmem_to_hbm [thread:$0]  %s860_s26, 128, %s1824_s4, [#allocation7]  }
 0x412   :  { %1383 = dma.done.wait [#allocation7], 128  }
 0x413   :  { %1384 = vsyncadd [#allocation7], 4294967168 }
 0x414   :  { %866 = vsyncpa [#allocation7], 1 }

</bundles_post_ra>
